<compile_context>
chip_gen: v7x
topology: tpu7x:2x2x1
jax: 0.10.0
libtpu: 0.0.40
codegen_flags: <defaults>
</compile_context>

<pallas_src>
import functools

import jax
import jax.numpy as jnp
from jax.experimental import pallas as pl
from jax.experimental.pallas import tpu as pltpu

_EPS = 1e-5


def _ln_withbias_kernel(x_ref, w_ref, b_ref, o_ref):
    x = x_ref[...].astype(jnp.float32)                    # (1, C, T)
    mu = jnp.mean(x, axis=1, keepdims=True)               # (1, 1, T)
    ex2 = jnp.mean(x * x, axis=1, keepdims=True)          # (1, 1, T)
    var = jnp.maximum(ex2 - mu * mu, 0.0)                 # unbiased=False
    inv = jax.lax.rsqrt(var + _EPS)
    w = w_ref[...].astype(jnp.float32)                    # (1, C, 1)
    b = b_ref[...].astype(jnp.float32)                    # (1, C, 1)
    o_ref[...] = ((x - mu) * inv * w + b).astype(o_ref.dtype)


def _ln_biasfree_kernel(x_ref, w_ref, o_ref):
    x = x_ref[...].astype(jnp.float32)                    # (1, C, T)
    mu = jnp.mean(x, axis=1, keepdims=True)
    ex2 = jnp.mean(x * x, axis=1, keepdims=True)
    var = jnp.maximum(ex2 - mu * mu, 0.0)                 # var IS centered ...
    inv = jax.lax.rsqrt(var + _EPS)
    w = w_ref[...].astype(jnp.float32)
    o_ref[...] = (x * inv * w).astype(o_ref.dtype)        # ... but mean NOT subtracted


def _choose_tile_hw(C, HW, itemsize, target_bytes=4 << 20, max_lanes=1 << 17):
    """Pick the lane-tile width along H*W.

    Legal widths: any multiple of 128, or exactly HW (the full dim).
    Targets ~`target_bytes` per input tile so that the double-buffered
    (input + output) tiles stay well under the scoped VMEM limit on all
    generations (v5e/v6e/v7x).
    """
    if HW <= 128:
        return HW
    t = target_bytes // max(1, C * itemsize)
    t = int(max(128, min(t, max_lanes)))
    t = (t // 128) * 128
    if t >= HW:
        return HW            # single tile over the full dim (always legal)
    return t


def _layernorm_bc_hw(x3, weight, bias, *, layernorm_type, tile_hw=None):
    """x3: (B, C, HW); LayerNorm over C for every (b, hw) position."""
    B, C, HW = x3.shape
    if tile_hw is None:
        tile_hw = _choose_tile_hw(C, HW, x3.dtype.itemsize)
    # Validate a user-provided tile (must be a multiple of 128 or the full dim).
    if tile_hw != HW and (tile_hw % 128 != 0 or tile_hw <= 0):
        raise ValueError(f"tile_hw={tile_hw} must be a multiple of 128 or == HW={HW}")
    grid = (B, pl.cdiv(HW, tile_hw))

    x_spec = pl.BlockSpec((1, C, tile_hw), lambda b, t: (b, 0, t))
    # Params are tiny; constant block index -> not re-DMA'd between
    # consecutive grid steps.
    p_spec = pl.BlockSpec((1, C, 1), lambda b, t: (0, 0, 0))

    w3 = weight.reshape(1, C, 1)
    if layernorm_type == "BiasFree":
        kernel = _ln_biasfree_kernel
        in_specs = [x_spec, p_spec]
        args = (x3, w3)
    else:
        kernel = _ln_withbias_kernel
        in_specs = [x_spec, p_spec, p_spec]
        args = (x3, w3, bias.reshape(1, C, 1))

    # VMEM budget: double-buffered input + output tiles (f32 compute copies
    # live in vregs / are fused).  Leave generous headroom under 32 MiB.
    tile_bytes = C * tile_hw * x3.dtype.itemsize
    vmem_budget = min(64 * 1024 * 1024,
                      max(8 * 1024 * 1024, 6 * tile_bytes))

    return pl.pallas_call(
        kernel,
        out_shape=jax.ShapeDtypeStruct((B, C, HW), x3.dtype),
        grid_spec=pltpu.PrefetchScalarGridSpec(
            num_scalar_prefetch=0,
            grid=grid,
            in_specs=in_specs,
            out_specs=x_spec,
        ),
        compiler_params=pltpu.CompilerParams(
            dimension_semantics=("parallel", "parallel"),
            vmem_limit_bytes=int(vmem_budget),
        ),
    )(*args)


@functools.partial(jax.jit, static_argnames=("layernorm_type", "tile_hw"))
def layernorm_nchw(x, weight, bias=None, *, layernorm_type="WithBias",
                   tile_hw=None):
    """x: (B, C, H, W) -> LayerNorm over channel dim per spatial location."""
    B, C, H, W = x.shape
    x3 = x.reshape(B, C, H * W)              # contiguous: no data movement
    y3 = _layernorm_bc_hw(x3, weight, bias,
                          layernorm_type=layernorm_type, tile_hw=tile_hw)
    return y3.reshape(B, C, H, W)


def _reference_nchw(x, weight, bias, layernorm_type):
    x3 = jnp.transpose(x, (0, 2, 3, 1)).astype(jnp.float32)  # (B,H,W,C)
    mu = jnp.mean(x3, axis=-1, keepdims=True)
    var = jnp.mean((x3 - mu) ** 2, axis=-1, keepdims=True)
    inv = 1.0 / jnp.sqrt(var + 1e-5)
    w = weight.astype(jnp.float32)
    if layernorm_type == "BiasFree":
        y = x3 * inv * w
    else:
        y = (x3 - mu) * inv * w + bias.astype(jnp.float32)
    return jnp.transpose(y, (0, 3, 1, 2)).astype(x.dtype)


if __name__ == "__main__":
    key = jax.random.PRNGKey(0)
    B, C, H, W = 2, 4, 16, 16
    x = jax.random.normal(key, (B, C, H, W), dtype=jnp.float32)

    # Deterministic parameter init (matches nn.Parameter defaults in __init__).
    weight = jnp.ones((C,), dtype=jnp.float32)
    bias = jnp.zeros((C,), dtype=jnp.float32)

    ok = True
    for ln_type in ("WithBias", "BiasFree"):
        y = layernorm_nchw(x, weight, bias, layernorm_type=ln_type)
        y = jax.block_until_ready(y)
        y_ref = _reference_nchw(x, weight, bias, ln_type)
        ok &= bool(jnp.allclose(y, y_ref, atol=1e-5, rtol=1e-5))

    # Ragged-tail path: H*W (=400) not a multiple of the forced 128-lane tile,
    # with non-trivial weight/bias to exercise the broadcasts.
    C2 = 8
    x2 = jax.random.normal(jax.random.PRNGKey(1), (1, C2, 20, 20),
                           dtype=jnp.float32)
    w2 = jnp.full((C2,), 0.5, dtype=jnp.float32)
    b2 = jnp.full((C2,), 0.1, dtype=jnp.float32)
    y2 = jax.block_until_ready(
        layernorm_nchw(x2, w2, b2, layernorm_type="WithBias", tile_hw=128))
    ok &= bool(jnp.allclose(y2, _reference_nchw(x2, w2, b2, "WithBias"),
                            atol=1e-5, rtol=1e-5))

    assert ok, "Pallas LayerNorm does not match reference"
    print("KERNEL_OK")
</pallas_src>

<mosaic_0001>
module attributes {stable_mosaic.version = 11 : i64} {
  func.func @_ln_withbias_kernel(%arg0: i32, %arg1: i32, %arg2: memref<1x4x256xf32, #tpu.memory_space<vmem>>, %arg3: memref<1x4x1xf32, #tpu.memory_space<vmem>>, %arg4: memref<1x4x1xf32, #tpu.memory_space<vmem>>, %arg5: memref<1x4x256xf32, #tpu.memory_space<vmem>>) attributes {dimension_semantics = [#tpu.dimension_semantics<parallel>, #tpu.dimension_semantics<parallel>], iteration_bounds = array<i64: 2, 1>, scalar_prefetch = 0 : i64, scratch_operands = 0 : i64, tpu.core_type = #tpu.core_type<tc>, window_params = [{transform_indices = @transform_0, window_bounds = array<i64: 1, 4, 256>}, {pipeline_mode = #tpu.pipeline_mode<synchronous>, transform_indices = @transform_1, window_bounds = array<i64: 1, 4, 1>}, {pipeline_mode = #tpu.pipeline_mode<synchronous>, transform_indices = @transform_2, window_bounds = array<i64: 1, 4, 1>}, {transform_indices = @transform_3, window_bounds = array<i64: 1, 4, 256>}]} {
    %c0 = arith.constant 0 : index
    %c0_0 = arith.constant 0 : index
    %c0_1 = arith.constant 0 : index
    %0 = vector.load %arg2[%c0, %c0_0, %c0_1] : memref<1x4x256xf32, #tpu.memory_space<vmem>>, vector<1x4x256xf32>
    %cst = arith.constant dense<0.000000e+00> : vector<1x256xf32>
    %1 = vector.multi_reduction <add>, %0, %cst [1] : vector<1x4x256xf32> to vector<1x256xf32>
    %2 = vector.shape_cast %1 : vector<1x256xf32> to vector<1x1x256xf32>
    %cst_2 = arith.constant 4.000000e+00 : f32
    %3 = vector.broadcast %cst_2 : f32 to vector<1x1x256xf32>
    %4 = arith.divf %2, %3 : vector<1x1x256xf32>
    %5 = arith.mulf %0, %0 : vector<1x4x256xf32>
    %cst_3 = arith.constant dense<0.000000e+00> : vector<1x256xf32>
    %6 = vector.multi_reduction <add>, %5, %cst_3 [1] : vector<1x4x256xf32> to vector<1x256xf32>
    %7 = vector.shape_cast %6 : vector<1x256xf32> to vector<1x1x256xf32>
    %cst_4 = arith.constant 4.000000e+00 : f32
    %8 = vector.broadcast %cst_4 : f32 to vector<1x1x256xf32>
    %9 = arith.divf %7, %8 : vector<1x1x256xf32>
    %10 = arith.mulf %4, %4 : vector<1x1x256xf32>
    %11 = arith.subf %9, %10 : vector<1x1x256xf32>
    %cst_5 = arith.constant 0.000000e+00 : f32
    %12 = vector.broadcast %cst_5 : f32 to vector<1x1x256xf32>
    %13 = arith.maximumf %11, %12 : vector<1x1x256xf32>
    %cst_6 = arith.constant 9.99999974E-6 : f32
    %14 = vector.broadcast %cst_6 : f32 to vector<1x1x256xf32>
    %15 = arith.addf %13, %14 : vector<1x1x256xf32>
    %16 = math.rsqrt %15 : vector<1x1x256xf32>
    %c0_7 = arith.constant 0 : index
    %c0_8 = arith.constant 0 : index
    %c0_9 = arith.constant 0 : index
    %17 = vector.load %arg3[%c0_7, %c0_8, %c0_9] : memref<1x4x1xf32, #tpu.memory_space<vmem>>, vector<1x4x1xf32>
    %c0_10 = arith.constant 0 : index
    %c0_11 = arith.constant 0 : index
    %c0_12 = arith.constant 0 : index
    %18 = vector.load %arg4[%c0_10, %c0_11, %c0_12] : memref<1x4x1xf32, #tpu.memory_space<vmem>>, vector<1x4x1xf32>
    %19 = vector.broadcast %4 : vector<1x1x256xf32> to vector<1x4x256xf32>
    %20 = arith.subf %0, %19 : vector<1x4x256xf32>
    %21 = vector.broadcast %16 : vector<1x1x256xf32> to vector<1x4x256xf32>
    %22 = arith.mulf %20, %21 : vector<1x4x256xf32>
    %23 = vector.broadcast %17 : vector<1x4x1xf32> to vector<1x4x256xf32>
    %24 = arith.mulf %22, %23 : vector<1x4x256xf32>
    %25 = vector.broadcast %18 : vector<1x4x1xf32> to vector<1x4x256xf32>
    %26 = arith.addf %24, %25 : vector<1x4x256xf32>
    %c0_13 = arith.constant 0 : index
    %c0_14 = arith.constant 0 : index
    %c0_15 = arith.constant 0 : index
    %27 = vector.load %arg5[%c0_13, %c0_14, %c0_15] : memref<1x4x256xf32, #tpu.memory_space<vmem>>, vector<1x4x256xf32>
    tpu.vector_store %arg5[%c0_13, %c0_14, %c0_15], %26 {strides = array<i32>} : memref<1x4x256xf32, #tpu.memory_space<vmem>>, vector<1x4x256xf32>,
    return
  }
  func.func @transform_0(%arg0: i32, %arg1: i32) -> (i32, i32, i32) {
    %c0_i32 = arith.constant 0 : i32
    %c0_i32_0 = arith.constant 0 : i32
    return %arg0, %c0_i32, %arg1 : i32, i32, i32
  }
  func.func @transform_1(%arg0: i32, %arg1: i32) -> (i32, i32, i32) {
    %c0_i32 = arith.constant 0 : i32
    %c0_i32_0 = arith.constant 0 : i32
    %c0_i32_1 = arith.constant 0 : i32
    %c0_i32_2 = arith.constant 0 : i32
    return %c0_i32, %c0_i32_0, %c0_i32_1 : i32, i32, i32
  }
  func.func @transform_2(%arg0: i32, %arg1: i32) -> (i32, i32, i32) {
    %c0_i32 = arith.constant 0 : i32
    %c0_i32_0 = arith.constant 0 : i32
    %c0_i32_1 = arith.constant 0 : i32
    %c0_i32_2 = arith.constant 0 : i32
    return %c0_i32, %c0_i32_0, %c0_i32_1 : i32, i32, i32
  }
  func.func @transform_3(%arg0: i32, %arg1: i32) -> (i32, i32, i32) {
    %c0_i32 = arith.constant 0 : i32
    %c0_i32_0 = arith.constant 0 : i32
    return %arg0, %c0_i32, %arg1 : i32, i32, i32
  }
}

</mosaic_0001>

<bundles_post_ra>
// kernel: layernorm_nchw.1
= control target key start
LH: loop header
LB: loop body
LE: loop exit
PB: predicated region body
PF: predicated region fallthrough
CT: control target
= control target key end

     0   :  { %s479_s12 = smov 0   ;;  %s481_s13 = smov 0   ;;  %s525_s0 = inlined_call_operand.vmem [shape: f32[2,4,256], index: 0, kind: input, shape index: {}]   ;;  %s526_s1 = inlined_call_operand.vmem [shape: f32[1,4,1], index: 1, kind: input, shape index: {}]   ;;  %s527_s2 = inlined_call_operand.vmem [shape: f32[1,4,1], index: 2, kind: input, shape index: {}]   ;;  %s528_s3 = inlined_call_operand.vmem [shape: f32[2,4,256], index: 3, kind: output, shape index: {}]  }
   0x1   :  { %s483_s14 = smov 0  }
   0x2 LB: > { %s25_s15 = sadd.s32 1, %s451_s13  ;;  %p392_p0 = scmp.ge.s32.totalorder %s455_s14, 1  ;;  %s455_s14 = sphi %s483_s14, %s13_s14   ;;  %s451_s13 = sphi %s481_s13, %s530_s13   ;;  %s447_s12 = sphi %s479_s12, %s529_s12  }
   0x3   : > { %p27_p1 = scmp.ge.s32.totalorder %s25_s15, 2  ;;  %p158_p2 = scmp.lt.s32.totalorder %s455_s14, 3 }
   0x5   : > { %s532_s15 = smov (%p27_p1, %s25_s15), 0  ;;  %p159_p3 = pnand %p392_p0, %p158_p2 }
   0x6   : > { %v262_v0 = vld [vmem:[%s526_s1] sm:$0xf] (!%p159_p3)  ;;  %v457_v1 = vmov (!%p159_p3), 0   ;;  %p191_p4 = scmp.lt.s32.totalorder (!%p159_p3), %s447_s12, 1  ;;  %vm214_vm0 = vcmask (!%p159_p3), 1043456   ;;  %v281_v49 = vlaneseq (!%p159_p3) }
   0x7   : > { %162 = sbr.rel (%p159_p3) target bundleno = 145 (0x91), region = 32  ;;  %427 = vset.pattern.permute.xlu0 (!%p159_p3), %v457_v1  ;;  %v263_v2 = vld [vmem:[%s527_s2] sm:$0xf] (!%p159_p3)  ;;  %v458_v47 = vmov (!%p159_p3), 839922192  }
   0x8   : > { %276 = vperm.xlu0 (!%p159_p3), %427, %v262_v0   ;;  %v279_v48 = vunpack.c.l.s4 (!%p159_p3), %v458_v47  ;;  %v282_v52 = vshrl.u32 (!%p159_p3), %v281_v49, 7 }
   0xa   : > { %v280_v51 = vunpack.c.0.s8 (!%p159_p3), %v279_v48 }
   0xc   : > { %289 = vperm.xlu0 (!%p159_p3), %427, %v263_v2   ;;  %v283_v55 = vsub.s32 (!%p159_p3), %v280_v51, %v282_v52 }
   0xe   : > { %s534_s12 = smov (!%p191_p4, %s447_s12), 1 }
   0xf   : > { %s399_s20 = sshll.u32 %s534_s12, 3 }
  0x10   : > { %s198_s23 = scalar_lea.vmem %s525_s0, %s399_s20  ;;  %s208_s26 = scalar_lea.vmem %s528_s3, %s399_s20 }
  0x11   : > { %v210_v3 = vld [vmem:[%s198_s23] sm:$0xff] }
  0x12   : > { %v212_v4 = vcombine.high %v210_v3, %v210_v3  ;;  %v232_v5 = vmul.f32 %v210_v3, %v210_v3  ;;  %v215_v6 = vsel %vm214_vm0, %v210_v3, 0.0 }
  0x13   : > { %v216_v9 = vrot.slane %v215_v6, 4 }
  0x14   : > { %v222_v7 = vsel %vm214_vm0, %v212_v4, 0.0  ;;  %v234_v8 = vcombine.high %v232_v5, %v232_v5  ;;  %v236_v11 = vsel %vm214_vm0, %v232_v5, 0.0 }
  0x15   : > { %v223_v10 = vrot.slane %v222_v7, 4  ;;  %v217_v13 = vadd.f32 %v216_v9, %v215_v6  ;;  %v237_v14 = vrot.slane %v236_v11, 4 }
  0x16   : > { %v243_v12 = vsel %vm214_vm0, %v234_v8, 0.0 }
  0x17   : > { %v224_v15 = vadd.f32 %v223_v10, %v222_v7  ;;  %v244_v16 = vrot.slane %v243_v12, 4  ;;  %v218_v17 = vrot.slane %v217_v13, 2  ;;  %v238_v18 = vadd.f32 %v237_v14, %v236_v11 }
  0x19   : > { %v225_v19 = vrot.slane %v224_v15, 2  ;;  %v245_v20 = vadd.f32 %v244_v16, %v243_v12  ;;  %v219_v21 = vadd.f32 %v218_v17, %v217_v13  ;;  %v239_v22 = vrot.slane %v238_v18, 2 }
  0x1b   : > { %v226_v23 = vadd.f32 %v225_v19, %v224_v15  ;;  %v246_v24 = vrot.slane %v245_v20, 2  ;;  %v220_v25 = vrot.slane %v219_v21, 1  ;;  %v240_v26 = vadd.f32 %v239_v22, %v238_v18 }
  0x1d   : > { %v227_v27 = vrot.slane %v226_v23, 1  ;;  %v247_v28 = vadd.f32 %v246_v24, %v245_v20  ;;  %v221_v29 = vadd.f32 %v220_v25, %v219_v21  ;;  %v241_v30 = vrot.slane %v240_v26, 1 }
  0x1f   : > { %v228_v31 = vadd.f32 %v227_v27, %v226_v23  ;;  %v248_v32 = vrot.slane %v247_v28, 1  ;;  %v230_v33 = vmul.f32 0.25, %v221_v29  ;;  %v242_v34 = vadd.f32 %v241_v30, %v240_v26 }
  0x21   : > { %v231_v35 = vmul.f32 0.25, %v228_v31  ;;  %v249_v36 = vadd.f32 %v248_v32, %v247_v28  ;;  %v250_v37 = vmul.f32 0.25, %v242_v34  ;;  %v252_v38 = vmul.f32 %v230_v33, %v230_v33 }
  0x23   : > { %v251_v39 = vmul.f32 0.25, %v249_v36  ;;  %v253_v40 = vmul.f32 %v231_v35, %v231_v35  ;;  %v254_v41 = vsub.f32 %v250_v37, %v252_v38  ;;  %v266_v53 = vcombine.low %v230_v33, %v231_v35 }
  0x25   : > { %v255_v42 = vsub.f32 %v251_v39, %v253_v40  ;;  %v256_v43 = vmax.f32 %v254_v41, 0.0  ;;  %v268_v56 = vsub.f32 %v210_v3, %v266_v53 }
  0x27   : > { %v257_v44 = vmax.f32 %v255_v42, 0.0  ;;  %v258_v45 = vadd.f32 1e-05, %v256_v43 }
  0x29   : > { %v259_v46 = vadd.f32 1e-05, %v257_v44  ;;  %429 = vrsqrt.f32 %v258_v45 }
  0x2b   : > { %431 = vrsqrt.f32 %v259_v46 }
  0x33   : > { %v430_v50 = vpop.eup %429 }
  0x35   : > { %v432_v54 = vpop.eup %431 }
  0x36   : > { %v271_v57 = vcombine.low %v430_v50, %v432_v54 }
  0x38   : > { %v273_v59 = vmul.f32 %v271_v57, %v268_v56 }
  0x87   : > { %v277_v58 = vpop.permute.xlu0 %276 }
  0x88   : > { %v284_v60 = vrot.slane %v277_v58, %v283_v55 }
  0x8a   : > { %v286_v62 = vmul.f32 %v284_v60, %v273_v59 }
  0x8b   : > { %v290_v61 = vpop.permute.xlu0 %289 }
  0x8c   : > { %v297_v63 = vrot.slane %v290_v61, %v283_v55 }
  0x8e   : > { %v299_v0 = vadd.f32 %v297_v63, %v286_v62 }
  0x90   : > { %300 = vst [vmem:[%s208_s26] sm:$0xff] %v299_v0 }
  0x91 PF: > { %s13_s14 = sadd.s32 1, %s455_s14   ;;  %s529_s12 = smov %s451_s13 }
  0x92   : > { %p10_p5 = scmp.ge.s32.totalorder %s13_s14, 4   ;;  %s530_s13 = smov %s532_s15 }
  0x94   :  { %12 = sbr.rel (!%p10_p5) target bundleno = 2 (0x2), region = 62 }

</bundles_post_ra>
